<compile_context>
chip_gen: v7x
topology: tpu7x:2x2x1
jax: 0.10.0
libtpu: 0.0.40
codegen_flags: <defaults>
</compile_context>

<pallas_src>
import functools
import math

import jax
import jax.numpy as jnp
from jax import lax
from jax.experimental import pallas as pl
from jax.experimental.pallas import tpu as pltpu

EPS = 1e-5


# --------------------------------------------------------------------------- #
# Kernel helpers
# --------------------------------------------------------------------------- #
def _row_stats(h):
    """Per-channel sum and sum-of-squares of a (rows, ch) tile via MXU matmul."""
    ones = jnp.ones((1, h.shape[0]), jnp.float32)
    s = jnp.dot(ones, h, preferred_element_type=jnp.float32)       # (1, ch)
    q = jnp.dot(ones, h * h, preferred_element_type=jnp.float32)   # (1, ch)
    return s, q


def _bn_fold(psum, psq, gamma, beta, count):
    """Reduce per-tile partial stats and fold BN into (scale, shift), one-pass var."""
    s = jnp.sum(psum, axis=0).reshape(1, -1)
    q = jnp.sum(psq, axis=0).reshape(1, -1)
    mean = s / count
    var = q / count - mean * mean
    scale = gamma.reshape(1, -1) * lax.rsqrt(var + EPS)
    shift = beta.reshape(1, -1) - mean * scale
    return scale, shift


def _row_tile(m, target):
    """Largest multiple-of-8 tile <= target that divides m (m must be % 8 == 0)."""
    t = min(target, m)
    t -= t % 8
    t = max(t, 8)
    while m % t:
        t -= 8
    return t


def _f32_bytes(*shapes):
    return 4 * sum(math.prod(s) for s in shapes)


def _cparams(block_bytes, scratch_bytes=0):
    # vmem_limit sized from the actual tile footprint (x2 for double buffering)
    # plus headroom, capped at the v7x physical budget.
    vmem = 2 * block_bytes + scratch_bytes + (8 << 20)
    return pltpu.CompilerParams(
        dimension_semantics=("parallel",),
        vmem_limit_bytes=int(min(vmem, 64 << 20)),
    )


# --------------------------------------------------------------------------- #
# Pass 1: a1 = conv1(x)  (1x1, C -> Cm) + partial BN1 stats
# --------------------------------------------------------------------------- #
def conv1_kernel(x_ref, w1_ref, a1_ref, sum_ref, sq_ref):
    x = x_ref[...].astype(jnp.float32)                         # (tm, C)
    a1 = jnp.dot(x, w1_ref[...], preferred_element_type=jnp.float32)
    a1_ref[...] = a1                                           # (tm, Cm)
    s, q = _row_stats(a1)
    sum_ref[...] = s
    sq_ref[...] = q


# --------------------------------------------------------------------------- #
# Pass 2: a2 = conv3x3(relu(bn1(a1)))  (per image) + partial BN2 stats
# --------------------------------------------------------------------------- #
def conv2_kernel(a1_ref, s1_ref, t1_ref, w2_ref, a2_ref, sum_ref, sq_ref,
                 hpad_ref, *, H, W, Cm):
    HW = H * W
    # BN1 normalize (folded scale/shift -> one FMA per element) + ReLU.
    z = jnp.maximum(a1_ref[...] * s1_ref[...] + t1_ref[...], 0.0)   # (HW, Cm)

    # Zero only the halo border; interior is fully overwritten below.
    zero_row = jnp.zeros((1, W + 2, Cm), jnp.float32)
    zero_col = jnp.zeros((H + 2, 1, Cm), jnp.float32)
    hpad_ref[0:1, :, :] = zero_row
    hpad_ref[H + 1:H + 2, :, :] = zero_row
    hpad_ref[:, 0:1, :] = zero_col
    hpad_ref[:, W + 1:W + 2, :] = zero_col
    hpad_ref[1:H + 1, 1:W + 1, :] = z.reshape(H, W, Cm)

    # im2col: 9 shifted taps -> (HW, 9*Cm) patches, ONE MXU matmul (K = 9*Cm).
    cols = [hpad_ref[ky:ky + H, kx:kx + W, :].reshape(HW, Cm)
            for ky in range(3) for kx in range(3)]
    patches = jnp.concatenate(cols, axis=-1)                        # (HW, 9*Cm)
    a2 = jnp.dot(patches, w2_ref[...], preferred_element_type=jnp.float32)
    a2_ref[...] = a2                                                # (HW, Cm)
    s, q = _row_stats(a2)
    sum_ref[...] = s
    sq_ref[...] = q


# --------------------------------------------------------------------------- #
# Pass 3: a3 = conv1x1(relu(bn2(a2)))  (Cm -> C) + partial BN3 stats
# --------------------------------------------------------------------------- #
def conv3_kernel(a2_ref, s2_ref, t2_ref, w3_ref, a3_ref, sum_ref, sq_ref):
    z = jnp.maximum(a2_ref[...] * s2_ref[...] + t2_ref[...], 0.0)   # (tm, Cm)
    a3 = jnp.dot(z, w3_ref[...], preferred_element_type=jnp.float32)
    a3_ref[...] = a3                                                # (tm, C)
    s, q = _row_stats(a3)
    sum_ref[...] = s
    sq_ref[...] = q


# --------------------------------------------------------------------------- #
# Pass 4: y = relu(x + bn3(a3))
# --------------------------------------------------------------------------- #
def residual_kernel(x_ref, a3_ref, s3_ref, t3_ref, o_ref):
    y = x_ref[...] + a3_ref[...] * s3_ref[...] + t3_ref[...]
    o_ref[...] = jnp.maximum(y, 0.0).astype(o_ref.dtype)


# --------------------------------------------------------------------------- #
# Wrappers
# --------------------------------------------------------------------------- #
def bottleneck_forward_nhwc(x_nhwc, p, *, block_rows=512):
    """x_nhwc: (N, H, W, C) float. Returns (N, H, W, C). Channels-last end-to-end."""
    N, H, W, C = x_nhwc.shape
    Cm = C // 4
    M = N * H * W
    HW = H * W
    assert C % 4 == 0 and M % 8 == 0

    x2d = x_nhwc.reshape(M, C).astype(jnp.float32)
    w1 = p['w1'].astype(jnp.float32)                       # (C, Cm)
    w2col = p['w2'].reshape(9 * Cm, Cm).astype(jnp.float32)  # taps stacked on rows
    w3 = p['w3'].astype(jnp.float32)                       # (Cm, C)
    # NOTE: conv biases b1/b2/b3 are exactly cancelled by training-mode BN mean
    # subtraction -> never loaded into the kernels (saves 3 slab adds + DMAs).

    tm = _row_tile(M, block_rows)
    g = M // tm

    # ---- pass 1: conv1 + BN1 partial stats (grid over M row tiles) ----------
    cp1 = _cparams(_f32_bytes((tm, C), (C, Cm), (tm, Cm), (1, Cm), (1, Cm)))
    a1, s1p, q1p = pl.pallas_call(
        conv1_kernel,
        grid=(g,),
        in_specs=[
            pl.BlockSpec((tm, C), lambda i: (i, 0)),
            pl.BlockSpec((C, Cm), lambda i: (0, 0)),
        ],
        out_specs=(
            pl.BlockSpec((tm, Cm), lambda i: (i, 0)),
            pl.BlockSpec((None, 1, Cm), lambda i: (i, 0, 0)),
            pl.BlockSpec((None, 1, Cm), lambda i: (i, 0, 0)),
        ),
        out_shape=(
            jax.ShapeDtypeStruct((M, Cm), jnp.float32),
            jax.ShapeDtypeStruct((g, 1, Cm), jnp.float32),
            jax.ShapeDtypeStruct((g, 1, Cm), jnp.float32),
        ),
        compiler_params=cp1,
    )(x2d, w1)
    scale1, shift1 = _bn_fold(s1p, q1p, p['g1'], p['be1'], float(M))

    # ---- pass 2: bn1 + relu + 3x3 conv + BN2 partial stats (grid over N) ----
    a1_img = a1.reshape(N, HW, Cm)
    cp2 = _cparams(
        _f32_bytes((HW, Cm), (HW, Cm), (1, Cm), (1, Cm), (9 * Cm, Cm),
                   (1, Cm), (1, Cm), (HW, 9 * Cm)),
        scratch_bytes=_f32_bytes((H + 2, W + 2, Cm)),
    )
    a2_img, s2p, q2p = pl.pallas_call(
        functools.partial(conv2_kernel, H=H, W=W, Cm=Cm),
        grid=(N,),
        in_specs=[
            pl.BlockSpec((None, HW, Cm), lambda n: (n, 0, 0)),
            pl.BlockSpec((1, Cm), lambda n: (0, 0)),
            pl.BlockSpec((1, Cm), lambda n: (0, 0)),
            pl.BlockSpec((9 * Cm, Cm), lambda n: (0, 0)),
        ],
        out_specs=(
            pl.BlockSpec((None, HW, Cm), lambda n: (n, 0, 0)),
            pl.BlockSpec((None, 1, Cm), lambda n: (n, 0, 0)),
            pl.BlockSpec((None, 1, Cm), lambda n: (n, 0, 0)),
        ),
        out_shape=(
            jax.ShapeDtypeStruct((N, HW, Cm), jnp.float32),
            jax.ShapeDtypeStruct((N, 1, Cm), jnp.float32),
            jax.ShapeDtypeStruct((N, 1, Cm), jnp.float32),
        ),
        scratch_shapes=[pltpu.VMEM((H + 2, W + 2, Cm), jnp.float32)],
        compiler_params=cp2,
    )(a1_img, scale1, shift1, w2col)
    scale2, shift2 = _bn_fold(s2p, q2p, p['g2'], p['be2'], float(M))

    # ---- pass 3: bn2 + relu + conv3 + BN3 partial stats (grid over M tiles) -
    a2_2d = a2_img.reshape(M, Cm)
    cp3 = _cparams(_f32_bytes((tm, Cm), (1, Cm), (1, Cm), (Cm, C),
                              (tm, C), (1, C), (1, C)))
    a3, s3p, q3p = pl.pallas_call(
        conv3_kernel,
        grid=(g,),
        in_specs=[
            pl.BlockSpec((tm, Cm), lambda i: (i, 0)),
            pl.BlockSpec((1, Cm), lambda i: (0, 0)),
            pl.BlockSpec((1, Cm), lambda i: (0, 0)),
            pl.BlockSpec((Cm, C), lambda i: (0, 0)),
        ],
        out_specs=(
            pl.BlockSpec((tm, C), lambda i: (i, 0)),
            pl.BlockSpec((None, 1, C), lambda i: (i, 0, 0)),
            pl.BlockSpec((None, 1, C), lambda i: (i, 0, 0)),
        ),
        out_shape=(
            jax.ShapeDtypeStruct((M, C), jnp.float32),
            jax.ShapeDtypeStruct((g, 1, C), jnp.float32),
            jax.ShapeDtypeStruct((g, 1, C), jnp.float32),
        ),
        compiler_params=cp3,
    )(a2_2d, scale2, shift2, w3)
    scale3, shift3 = _bn_fold(s3p, q3p, p['g3'], p['be3'], float(M))

    # ---- pass 4: bn3 + residual + relu (grid over M tiles) ------------------
    cp4 = _cparams(_f32_bytes((tm, C), (tm, C), (1, C), (1, C), (tm, C)))
    y2d = pl.pallas_call(
        residual_kernel,
        grid=(g,),
        in_specs=[
            pl.BlockSpec((tm, C), lambda i: (i, 0)),
            pl.BlockSpec((tm, C), lambda i: (i, 0)),
            pl.BlockSpec((1, C), lambda i: (0, 0)),
            pl.BlockSpec((1, C), lambda i: (0, 0)),
        ],
        out_specs=pl.BlockSpec((tm, C), lambda i: (i, 0)),
        out_shape=jax.ShapeDtypeStruct((M, C), x_nhwc.dtype),
        compiler_params=cp4,
    )(x2d, a3, scale3, shift3)

    return y2d.reshape(N, H, W, C)


def bottleneck_forward(x_nchw, p, *, block_rows=512):
    """NCHW wrapper matching the PyTorch module layout.

    Prefer bottleneck_forward_nhwc and keep the surrounding model channels-last
    end-to-end: these two transposes are full HBM round trips of the tensor.
    """
    x_nhwc = jnp.transpose(x_nchw, (0, 2, 3, 1))
    y = bottleneck_forward_nhwc(x_nhwc, p, block_rows=block_rows)
    return jnp.transpose(y, (0, 3, 1, 2))


# --------------------------------------------------------------------------- #
# Pure-JAX reference (same semantics as the PyTorch module in training mode,
# INCLUDING the conv biases — verifies that dropping them in the kernels is
# exactly cancelled by the BN mean subtraction).
# --------------------------------------------------------------------------- #
def ref_forward(x_nchw, p):
    Cm = p['w1'].shape[1]
    x = jnp.transpose(x_nchw, (0, 2, 3, 1)).astype(jnp.float32)  # NHWC

    def bn(h, g, b):
        m = jnp.mean(h, axis=(0, 1, 2), keepdims=True)
        v = jnp.mean((h - m) ** 2, axis=(0, 1, 2), keepdims=True)
        return (h - m) / jnp.sqrt(v + EPS) * g + b

    h = jnp.einsum('nhwc,co->nhwo', x, p['w1']) + p['b1'][0]
    h = jax.nn.relu(bn(h, p['g1'][0], p['be1'][0]))
    w2_hwio = p['w2'].reshape(3, 3, Cm, Cm)
    h = lax.conv_general_dilated(h, w2_hwio, (1, 1), 'SAME',
                                 dimension_numbers=('NHWC', 'HWIO', 'NHWC'))
    h = h + p['b2'][0]
    h = jax.nn.relu(bn(h, p['g2'][0], p['be2'][0]))
    h = jnp.einsum('nhwc,co->nhwo', h, p['w3']) + p['b3'][0]
    h = bn(h, p['g3'][0], p['be3'][0])
    y = jax.nn.relu(x + h)
    return jnp.transpose(y, (0, 3, 1, 2))


if __name__ == "__main__":
    N, C, H, W = 2, 16, 8, 8      # channel=16 -> bottleneck width 4
    Cm = C // 4

    key = jax.random.PRNGKey(0)
    ks = jax.random.split(key, 13)
    x = jax.random.normal(ks[0], (N, C, H, W), jnp.float32)

    # Conv weights stored as (C_in, C_out) for 1x1, and (9, C_in, C_out) for the
    # 3x3 conv (index k = 3*kh + kw), i.e. PyTorch weight.transpose(2,3,1,0).
    params = dict(
        w1=jax.random.normal(ks[1], (C, Cm), jnp.float32) / jnp.sqrt(C),
        b1=0.1 * jax.random.normal(ks[2], (1, Cm), jnp.float32),
        g1=1.0 + 0.1 * jax.random.normal(ks[3], (1, Cm), jnp.float32),
        be1=0.1 * jax.random.normal(ks[4], (1, Cm), jnp.float32),
        w2=jax.random.normal(ks[5], (9, Cm, Cm), jnp.float32) / jnp.sqrt(9 * Cm),
        b2=0.1 * jax.random.normal(ks[6], (1, Cm), jnp.float32),
        g2=1.0 + 0.1 * jax.random.normal(ks[7], (1, Cm), jnp.float32),
        be2=0.1 * jax.random.normal(ks[8], (1, Cm), jnp.float32),
        w3=jax.random.normal(ks[9], (Cm, C), jnp.float32) / jnp.sqrt(Cm),
        b3=0.1 * jax.random.normal(ks[10], (1, C), jnp.float32),
        g3=1.0 + 0.1 * jax.random.normal(ks[11], (1, C), jnp.float32),
        be3=0.1 * jax.random.normal(ks[12], (1, C), jnp.float32),
    )

    # block_rows=64 so the toy shape (M = 128 rows) exercises a multi-step grid.
    out = jax.block_until_ready(bottleneck_forward(x, params, block_rows=64))
    ref = jax.block_until_ready(ref_forward(x, params))

    assert out.shape == x.shape and out.dtype == x.dtype
    max_err = float(jnp.max(jnp.abs(out - ref)))
    assert jnp.allclose(out, ref, atol=1e-3, rtol=1e-3), f"max_err={max_err}"
    print("KERNEL_OK")
</pallas_src>

<mosaic_0001>
module attributes {stable_mosaic.version = 11 : i64} {
  func.func @conv1_kernel(%arg0: i32, %arg1: memref<64x16xf32, #tpu.memory_space<vmem>>, %arg2: memref<16x4xf32, #tpu.memory_space<vmem>>, %arg3: memref<64x4xf32, #tpu.memory_space<vmem>>, %arg4: memref<1x1x4xf32, #tpu.memory_space<vmem>>, %arg5: memref<1x1x4xf32, #tpu.memory_space<vmem>>) attributes {dimension_semantics = [#tpu.dimension_semantics<parallel>], iteration_bounds = array<i64: 2>, scalar_prefetch = 0 : i64, scratch_operands = 0 : i64, tpu.core_type = #tpu.core_type<tc>, window_params = [{transform_indices = @transform_0, window_bounds = array<i64: 64, 16>}, {pipeline_mode = #tpu.pipeline_mode<synchronous>, transform_indices = @transform_1, window_bounds = array<i64: 16, 4>}, {transform_indices = @transform_2, window_bounds = array<i64: 64, 4>}, {transform_indices = @transform_3, window_bounds = array<i64: 1, 1, 4>}, {transform_indices = @transform_4, window_bounds = array<i64: 1, 1, 4>}]} {
    %c0 = arith.constant 0 : index
    %c0_0 = arith.constant 0 : index
    %0 = vector.load %arg1[%c0, %c0_0] : memref<64x16xf32, #tpu.memory_space<vmem>>, vector<64x16xf32>
    %c0_1 = arith.constant 0 : index
    %c0_2 = arith.constant 0 : index
    %1 = vector.load %arg2[%c0_1, %c0_2] : memref<16x4xf32, #tpu.memory_space<vmem>>, vector<16x4xf32>
    %cst = arith.constant dense<0.000000e+00> : vector<64x4xf32>
    %2 = tpu.matmul %0, %1, %cst {dimension_numbers = #tpu.dot_dimension_numbers<[1], [0], [0], [1], [0, 0, 1, 1], [], []>} : vector<64x16xf32>, vector<16x4xf32>, vector<64x4xf32> -> vector<64x4xf32>
    %c0_3 = arith.constant 0 : index
    %c0_4 = arith.constant 0 : index
    %3 = vector.load %arg3[%c0_3, %c0_4] : memref<64x4xf32, #tpu.memory_space<vmem>>, vector<64x4xf32>
    tpu.vector_store %arg3[%c0_3, %c0_4], %2 {strides = array<i32>} : memref<64x4xf32, #tpu.memory_space<vmem>>, vector<64x4xf32>,
    %cst_5 = arith.constant 1.000000e+00 : f32
    %4 = vector.broadcast %cst_5 : f32 to vector<1x64xf32>
    %cst_6 = arith.constant dense<0.000000e+00> : vector<1x4xf32>
    %5 = tpu.matmul %4, %2, %cst_6 {dimension_numbers = #tpu.dot_dimension_numbers<[1], [0], [0], [1], [0, 0, 1, 1], [], []>} : vector<1x64xf32>, vector<64x4xf32>, vector<1x4xf32> -> vector<1x4xf32>
    %6 = arith.mulf %2, %2 : vector<64x4xf32>
    %cst_7 = arith.constant dense<0.000000e+00> : vector<1x4xf32>
    %7 = tpu.matmul %4, %6, %cst_7 {dimension_numbers = #tpu.dot_dimension_numbers<[1], [0], [0], [1], [0, 0, 1, 1], [], []>} : vector<1x64xf32>, vector<64x4xf32>, vector<1x4xf32> -> vector<1x4xf32>
    %c0_8 = arith.constant 0 : index
    %c0_9 = arith.constant 0 : index
    %c0_10 = arith.constant 0 : index
    %8 = vector.load %arg4[%c0_8, %c0_9, %c0_10] : memref<1x1x4xf32, #tpu.memory_space<vmem>>, vector<1x1x4xf32>
    %9 = vector.shape_cast %8 : vector<1x1x4xf32> to vector<1x4xf32>
    %10 = vector.shape_cast %5 : vector<1x4xf32> to vector<1x1x4xf32>
    tpu.vector_store %arg4[%c0_8, %c0_9, %c0_10], %10 {strides = array<i32>} : memref<1x1x4xf32, #tpu.memory_space<vmem>>, vector<1x1x4xf32>,
    %c0_11 = arith.constant 0 : index
    %c0_12 = arith.constant 0 : index
    %c0_13 = arith.constant 0 : index
    %11 = vector.load %arg5[%c0_11, %c0_12, %c0_13] : memref<1x1x4xf32, #tpu.memory_space<vmem>>, vector<1x1x4xf32>
    %12 = vector.shape_cast %11 : vector<1x1x4xf32> to vector<1x4xf32>
    %13 = vector.shape_cast %7 : vector<1x4xf32> to vector<1x1x4xf32>
    tpu.vector_store %arg5[%c0_11, %c0_12, %c0_13], %13 {strides = array<i32>} : memref<1x1x4xf32, #tpu.memory_space<vmem>>, vector<1x1x4xf32>,
    return
  }
  func.func @transform_0(%arg0: i32) -> (i32, i32) {
    %c0_i32 = arith.constant 0 : i32
    %c0_i32_0 = arith.constant 0 : i32
    return %arg0, %c0_i32 : i32, i32
  }
  func.func @transform_1(%arg0: i32) -> (i32, i32) {
    %c0_i32 = arith.constant 0 : i32
    %c0_i32_0 = arith.constant 0 : i32
    %c0_i32_1 = arith.constant 0 : i32
    return %c0_i32, %c0_i32_0 : i32, i32
  }
  func.func @transform_2(%arg0: i32) -> (i32, i32) {
    %c0_i32 = arith.constant 0 : i32
    %c0_i32_0 = arith.constant 0 : i32
    return %arg0, %c0_i32 : i32, i32
  }
  func.func @transform_3(%arg0: i32) -> (i32, i32, i32) {
    %c0_i32 = arith.constant 0 : i32
    %c0_i32_0 = arith.constant 0 : i32
    %c0_i32_1 = arith.constant 0 : i32
    return %arg0, %c0_i32, %c0_i32_0 : i32, i32, i32
  }
  func.func @transform_4(%arg0: i32) -> (i32, i32, i32) {
    %c0_i32 = arith.constant 0 : i32
    %c0_i32_0 = arith.constant 0 : i32
    %c0_i32_1 = arith.constant 0 : i32
    return %arg0, %c0_i32, %c0_i32_0 : i32, i32, i32
  }
}

</mosaic_0001>

<bundles_post_ra>
// kernel: tpu_custom_call.1
= control target key start
LH: loop header
LB: loop body
LE: loop exit
PB: predicated region body
PF: predicated region fallthrough
CT: control target
= control target key end

     0   :  { %10 = vsyncpa [#allocation3], 0  ;;  %s1155_s0 = inlined_call_operand.vmem [shape: f32[128,16], index: 0, kind: input, shape index: {}]   ;;  %s1156_s1 = inlined_call_operand.vmem [shape: f32[16,4], index: 1, kind: input, shape index: {}]   ;;  %s1157_s2 = inlined_call_operand.vmem [shape: f32[128,4], index: 2, kind: output, shape index: {0}]   ;;  %s1158_s3 = inlined_call_operand.hbm [shape: f32[2,1,4], index: 3, kind: output, shape index: {1}]   ;;  %s1159_s4 = inlined_call_operand.hbm [shape: f32[2,1,4], index: 4, kind: output, shape index: {2}]  }
   0x1   :  { %12 = vsyncpa [#allocation3 + $0x1], 0 }
   0x2   :  { %13 = vsyncpa [#allocation5], 0 }
   0x3   :  { %15 = vsyncpa [#allocation5 + $0x1], 0  ;;  %s978_s15 = smov 0   ;;  %s980_s16 = smov 0  }
   0x4   :  { %s982_s17 = smov 0   ;;  %s984_s18 = smov 0  }
   0x5 LB: > { %s999_s19 = sadd.s32 4294967295, %s945_s18   ;;  %s671_s20 = sadd.s32 4294967294, %s945_s18   ;;  %s945_s18 = sphi %s984_s18, %s1165_s18   ;;  %s941_s17 = sphi %s982_s17, %s1164_s17   ;;  %s937_s16 = sphi %s980_s16, %s1163_s16   ;;  %s933_s15 = sphi %s978_s15, %s1162_s15  }
   0x6   : > { %s1003_s21 = sadd.s32 1, %s945_s18   ;;  %s101_s22 = sadd.s32 1, %s941_s17 }
   0x7   : > { %s98_s23 = ssub.s32 %s945_s18, %s1003_s21  ;;  %p111_p0 = scmp.ne.s32.totalorder %s941_s17, %s937_s16 }
   0x8   : > { %p99_p1 = scmp.eq.s32.totalorder %s98_s23, 0  ;;  %p112_p2 = scmp.eq.s32.totalorder %s999_s19, 1 }
   0x9   : > { %p117_p3 = scmp.ne.s32.totalorder %s937_s16, %s933_s15  ;;  %p118_p4 = scmp.eq.s32.totalorder %s671_s20, 1 }
   0xa   : > { %s1014_s24 = scalar_select %p99_p1, %s941_s17, %s101_s22  }
   0xb   : > { %p1016_p5 = por %p112_p2, %p111_p0  ;;  %p1020_p6 = por %p118_p4, %p117_p3 }
   0xc   : > { %p674_p7 = scmp.ge.s32.totalorder %s945_s18, 1  ;;  %p174_p8 = scmp.lt.s32.totalorder %s945_s18, 3 }
   0xe   : > { %p175_p9 = pnand %p674_p7, %p174_p8 }
   0xf   : > { %v228_v0 = vld [vmem:[%s1156_s1] sm:$0xff] (!%p175_p9)  ;;  %v229_v1 = vld [vmem:[%s1156_s1 + $0x8] sm:$0xff] (!%p175_p9)  ;;  %s675_s5 = sshll.u32 (!%p175_p9), %s999_s19, 3  ;;  %vm230_vm0 = vcmask (!%p175_p9), 130048   ;;  %v947_v11 = vmov (!%p175_p9), 0.0|0.0   ;;  %vm948_vm1 = vmmov (!%p175_p9), 0  }
  0x10   : > { %178 = sbr.rel (%p175_p9) target bundleno = 508 (0x1fc), region = 28  ;;  %v775_v2 = vpack.c.bf16 (!%p175_p9), %v229_v1, %v228_v0  ;;  %p209_p10 = scmp.lt.s32.totalorder (!%p175_p9), %s675_s5, 15  ;;  %779 = vmatprep.subr.bf16.mxu1 (!%p175_p9), %v947_v11  ;;  %v949_v12 = vmov (!%p175_p9), 0.0   ;;  %vm360_vm2 = vcmask (!%p175_p9), 31744   ;;  %vm369_vm3 = vcmask (!%p175_p9), 523264  }
  0x11   : > { %753 = vmatprep.mubr.msk.f32.mxu1 (!%p175_p9), %vm948_vm1, %v949_v12  ;;  %v950_v37 = vmov (!%p175_p9), 1.0   ;;  %s1069_s13 = sand.u32 (!%p175_p9), 1, %s937_s16   ;;  %s689_s14 = sshll.u32 (!%p175_p9), %s999_s19, 4  ;;  %vm521_vm4 = vcmask (!%p175_p9), 24576  }
  0x12   : > { %776 = vmatprep.subr.bf16.mxu0 (!%p175_p9), %v775_v2  ;;  %s201_s20 = scalar_lea.vmem (!%p175_p9), [#allocation2], %s1069_s13  ;;  %s207_s23 = scalar_lea.vmem (!%p175_p9), [#allocation4], %s1069_s13 }
  0x13   : > { %778 = vmatpush3.bf16.msra.mxu0 (!%p175_p9), %v775_v2  ;;  %s550_s22 = sshll.u32 (!%p175_p9), %s201_s20, 4  ;;  %s563_s27 = sshll.u32 (!%p175_p9), %s207_s23, 4  ;;  %s1081_s22 = int_to_ptr.vmem [resolvable:$true] %s550_s22  ;;  %s1089_s27 = int_to_ptr.vmem [resolvable:$true] %s563_s27 }
  0x14   : > { %791 = vmatprep.subr.bf16.mxu0 (!%p175_p9), %v947_v11  ;;  %s1079_s30 = scalar_lea.hbm (!%p175_p9), %s1158_s3, %s689_s14  ;;  %s530_s7 = scalar_lea.sflag (!%p175_p9), [#allocation3], %s1069_s13 }
  0x15   : > { %s851_s8 = scalar_lea.vmem (!%p175_p9), %s1081_s22, 16 }
  0x16   : > { %p852_p11 = scmp.ne.s32.totalorder (!%p175_p9), %s1081_s22, %s851_s8 }
  0x17   : > { %s1167_s5 = smov (!%p209_p10, %s675_s5), 15 }
  0x18   : > { %s676_s6 = sshll.u32 %s1167_s5, 3  ;;  %p853_p12 = pnand %p852_p11, %p1016_p5 }
  0x19   : > { %s212_s9 = scalar_lea.vmem %s1155_s0, %s676_s6  ;;  %s1050_s12 = scalar_lea.vmem %s1157_s2, %s676_s6 }
  0x1a   : > { %v220_v3 = vld [vmem:[%s212_s9] sm:$0xff]  ;;  %v221_v4 = vld [vmem:[%s212_s9 + $0x8] sm:$0xff]  ;;  %v222_v5 = vld [vmem:[%s212_s9 + $0x10] sm:$0xff]  ;;  %s1087_s6 = scalar_lea.hbm %s1159_s4, %s689_s14  ;;  %p854_p13 = pneg %p853_p12 }
  0x1b   : > { %725 = vmatprep.mubr.msk.f32.mxu0 %vm230_vm0, %v220_v3  ;;  %v223_v6 = vld [vmem:[%s212_s9 + $0x18] sm:$0xff]  ;;  %v224_v7 = vld [vmem:[%s212_s9 + $0x20] sm:$0xff]  ;;  %v225_v8 = vld [vmem:[%s212_s9 + $0x28] sm:$0xff] }
  0x1c   : > { %726 = vmatmul.mubr.msk.f32.vlgmr.msra.gmra.mrb[0].mxu0 %vm230_vm0, %v221_v4  ;;  %v226_v9 = vld [vmem:[%s212_s9 + $0x30] sm:$0xff]  ;;  %v227_v10 = vld [vmem:[%s212_s9 + $0x38] sm:$0xff]  ;;  %s951_s9 = smov [#allocation2]  }
  0x1d   : > { %728 = vmatprep.mubr.msk.f32.mxu0 %vm230_vm0, %v222_v5  ;;  %s855_s10 = sshll.u32 %s951_s9, 4  ;;  %s856_s10 = int_to_ptr.vmem [resolvable:$false] %s855_s10 }
  0x1e   : > { %s857_s11 = scalar_lea.vmem %s856_s10, 32  ;;  %p858_p0 = scmp.lt.s32.totalorder %s1081_s22, %s856_s10 }
  0x1f   : > { %p859_p1 = scmp.lt.s32.totalorder %s857_s11, %s851_s8 }
  0x20   : > { %729 = vmatmul.mubr.msk.f32.gmra.mrb[2].mxu0 %vm230_vm0, %v223_v6 }
  0x21   : > { %731 = vmatprep.mubr.msk.f32.mxu0 %vm230_vm0, %v224_v7  ;;  %p860_p2 = por %p859_p1, %p858_p0 }
  0x23   : > { %p861_p3 = pnand %p860_p2, %p854_p13 }
  0x24   : > { %732 = vmatmul.mubr.msk.f32.gmra.mrb[4].mxu0 %vm230_vm0, %v225_v8 }
  0x25   : > { %734 = vmatprep.mubr.msk.f32.mxu0 %vm230_vm0, %v226_v9 }
  0x28   : > { %735 = vmatmul.mubr.msk.f32.gmra.mrb[6].mxu0 %vm230_vm0, %v227_v10 }
  0x29   : > { %772 = vmatprep.mubr.msk.f32.mxu0 %vm948_vm1, %v949_v12 }
  0xef   : > { %v727_v13 = vpop.f32.mrb[0].mxu0 }
  0xf0   : > { %362 = vst.msk [vmem:[%s1050_s12 + $0x8] sm:$0xff] %vm360_vm2, %v727_v13  ;;  %v444_v14 = vmul.f32 %v727_v13, %v727_v13  ;;  %v321_v15 = vpop.f32.mrb[1].mxu0 }
  0xf1   : > { %361 = vst.msk [vmem:[%s1050_s12] sm:$0xff] %vm360_vm2, %v321_v15  ;;  %v443_v16 = vmul.f32 %v321_v15, %v321_v15  ;;  %v780_v17 = vpack.c.bf16 %v727_v13, %v321_v15 }
  0xf3   : > { %v792_v18 = vpack.c.bf16 %v444_v14, %v443_v16  ;;  %v730_v19 = vpop.f32.mrb[2].mxu0  ;;  %781 = vmatpush3.bf16.msra.mxu1 %v780_v17 }
  0xf4   : > { %364 = vst.msk [vmem:[%s1050_s12 + $0x18] sm:$0xff] %vm360_vm2, %v730_v19  ;;  %v446_v20 = vmul.f32 %v730_v19, %v730_v19  ;;  %v331_v21 = vpop.f32.mrb[3].mxu0  ;;  %782 = vmatprep.subr.bf16.mxu1 %v947_v11 }
  0xf5   : > { %363 = vst.msk [vmem:[%s1050_s12 + $0x10] sm:$0xff] %vm360_vm2, %v331_v21  ;;  %v783_v22 = vpack.c.bf16 %v730_v19, %v331_v21  ;;  %v445_v23 = vmul.f32 %v331_v21, %v331_v21  ;;  %793 = vmatpush3.bf16.msra.mxu0 %v792_v18 }
  0xf6   : > { %794 = vmatprep.subr.bf16.mxu0 %v947_v11 }
  0xf7   : > { %v795_v24 = vpack.c.bf16 %v446_v20, %v445_v23  ;;  %v733_v25 = vpop.f32.mrb[4].mxu0  ;;  %784 = vmatpush3.bf16.msra.mxu1 %v783_v22 }
  0xf8   : > { %366 = vst.msk [vmem:[%s1050_s12 + $0x28] sm:$0xff] %vm360_vm2, %v733_v25  ;;  %v448_v26 = vmul.f32 %v733_v25, %v733_v25  ;;  %v341_v27 = vpop.f32.mrb[5].mxu0  ;;  %785 = vmatprep.subr.bf16.mxu1 %v947_v11 }
  0xf9   : > { %365 = vst.msk [vmem:[%s1050_s12 + $0x20] sm:$0xff] %vm360_vm2, %v341_v27  ;;  %v786_v28 = vpack.c.bf16 %v733_v25, %v341_v27  ;;  %v447_v29 = vmul.f32 %v341_v27, %v341_v27  ;;  %796 = vmatpush3.bf16.msra.mxu0 %v795_v24 }
  0xfa   : > { %797 = vmatprep.subr.bf16.mxu0 %v947_v11 }
  0xfb   : > { %v798_v30 = vpack.c.bf16 %v448_v26, %v447_v29  ;;  %v736_v31 = vpop.f32.mrb[6].mxu0  ;;  %787 = vmatpush3.bf16.msra.mxu1 %v786_v28 }
  0xfc   : > { %368 = vst.msk [vmem:[%s1050_s12 + $0x38] sm:$0xff] %vm360_vm2, %v736_v31  ;;  %v450_v32 = vmul.f32 %v736_v31, %v736_v31  ;;  %v351_v33 = vpop.f32.mrb[7].mxu0  ;;  %788 = vmatprep.subr.bf16.mxu1 %v947_v11 }
  0xfd   : > { %367 = vst.msk [vmem:[%s1050_s12 + $0x30] sm:$0xff] %vm360_vm2, %v351_v33  ;;  %v789_v34 = vpack.c.bf16 %v736_v31, %v351_v33  ;;  %v449_v35 = vmul.f32 %v351_v33, %v351_v33  ;;  %799 = vmatpush3.bf16.msra.mxu0 %v798_v30 }
  0xfe   : > { %800 = vmatprep.subr.bf16.mxu0 %v947_v11 }
  0xff   : > { %v801_v36 = vpack.c.bf16 %v450_v32, %v449_v35  ;;  %790 = vmatpush3.bf16.msra.mxu1 %v789_v34 }
 0x101   : > { %802 = vmatpush3.bf16.msra.mxu0 %v801_v36 }
 0x102   : > { %754 = vmatmul.mubr.msk.f32.vlgmr.msra.gmra.mrb[0].mxu1 %vm369_vm3, %v950_v37 }
 0x104   : > { %773 = vmatmul.mubr.msk.f32.vlgmr.msra.gmra.mrb[8].mxu0 %vm369_vm3, %v950_v37 }
 0x1d5   : > { %v439_v38 = vpop.f32.mrb[0].mxu1 }
 0x1d6   : > { %522 = vst.msk [vmem:[%s201_s20] sm:$0x1] %vm521_vm4, %v439_v38  ;;  %v755_v39 = vpop.f32.mrb[1].mxu1 }
 0x1d7   : > { %v517_v40 = vpop.f32.mrb[8].mxu0 }
 0x1d8   : > { %864 = shalt.err (!%p861_p3)
}
 0x1d9   : > { %s865_s12 = scalar_lea.hbm %s1079_s30, 16  ;;  %s869_s28 = scalar_lea.hbm %s1158_s3, 32 }
 0x1da   : > { %p866_p4 = scmp.ne.s32.totalorder %s1079_s30, %s865_s12  ;;  %p870_p9 = scmp.lt.u32.totalorder %s1079_s30, %s1158_s3 }
 0x1db   : > { %p871_p10 = scmp.lt.u32.totalorder %s869_s28, %s865_s12  ;;  %p873_p12 = scmp.lt.u32.totalorder %s865_s12, %s1079_s30 }
 0x1dc   : > { %p867_p7 = pnand %p866_p4, %p1016_p5 }
 0x1dd   : > { %p872_p11 = por %p871_p10, %p870_p9 }
 0x1de   : > { %p868_p8 = pneg %p867_p7 }
 0x1df   : > { %p874_p13 = por %p873_p12, %p872_p11 }
 0x1e1   : > { %p875_p0 = pnand %p874_p13, %p868_p8 }
 0x1e3   : > { %878 = shalt.err (!%p875_p0)
}
 0x1e4   : > { %803 = dma.vmem_to_hbm [thread:$0]  (%p1016_p5), %s1081_s22, 16, %s1079_s30, %s530_s7   ;;  %523 = vst.msk [vmem:[%s207_s23] sm:$0x1] %vm521_vm4, %v517_v40  ;;  %v774_v41 = vpop.f32.mrb[9].mxu0 }
 0x1e5   : > { %s534_s5 = scalar_lea.sflag [#allocation5], %s1069_s13  ;;  %s879_s8 = scalar_lea.vmem %s1089_s27, 16 }
 0x1e6   : > { %p880_p1 = scmp.ne.s32.totalorder %s1089_s27, %s879_s8  ;;  %s952_s9 = smov [#allocation4]  }
 0x1e7   : > { %s883_s10 = sshll.u32 %s952_s9, 4  ;;  %s884_s10 = int_to_ptr.vmem [resolvable:$false] %s883_s10 }
 0x1e8   : > { %p881_p2 = pnand %p880_p1, %p1016_p5  ;;  %s885_s11 = scalar_lea.vmem %s884_s10, 32 }
 0x1e9   : > { %p886_p4 = scmp.lt.s32.totalorder %s1089_s27, %s884_s10  ;;  %p887_p7 = scmp.lt.s32.totalorder %s885_s11, %s879_s8 }
 0x1ea   : > { %p882_p3 = pneg %p881_p2 }
 0x1eb   : > { %p888_p8 = por %p887_p7, %p886_p4 }
 0x1ed   : > { %p889_p9 = pnand %p888_p8, %p882_p3 }
 0x1ef   : > { %892 = shalt.err (!%p889_p9)
}
 0x1f0   : > { %s893_s13 = scalar_lea.hbm %s1087_s6, 16  ;;  %s897_s30 = scalar_lea.hbm %s1159_s4, 32 }
 0x1f1   : > { %p894_p10 = scmp.ne.s32.totalorder %s1087_s6, %s893_s13  ;;  %p898_p13 = scmp.lt.u32.totalorder %s1087_s6, %s1159_s4 }
 0x1f2   : > { %p899_p0 = scmp.lt.u32.totalorder %s897_s30, %s893_s13  ;;  %p901_p2 = scmp.lt.u32.totalorder %s893_s13, %s1087_s6 }
 0x1f3   : > { %p895_p11 = pnand %p894_p10, %p1016_p5 }
 0x1f4   : > { %p900_p1 = por %p899_p0, %p898_p13 }
 0x1f5   : > { %p896_p12 = pneg %p895_p11 }
 0x1f6   : > { %p902_p3 = por %p901_p2, %p900_p1 }
 0x1f8   : > { %p903_p4 = pnand %p902_p3, %p896_p12 }
 0x1fa   : > { %906 = shalt.err (!%p903_p4)
}
 0x1fb   : > { %804 = dma.vmem_to_hbm [thread:$0]  (%p1016_p5), %s1089_s27, 16, %s1087_s6, %s534_s5  }
 0x1fc PF: > { %p814_p7 = scmp.ge.s32.totalorder %s945_s18, 2  ;;  %s583_s14 = sand.u32 1, %s933_s15  }
 0x1fd   : > { %s584_s20 = scalar_lea.sflag [#allocation3], %s583_s14 }
 0x1fe   : > { %p808_p8 = pnand %p814_p7, %p1020_p6 }
 0x200   : > { %924 = dma.done.wait (!%p808_p8), %s584_s20, 16  }
 0x201   : > { %926 = vsyncadd (!%p808_p8), %s584_s20, 4294967280  ;;  %s592_s28 = scalar_lea.sflag [#allocation5], %s583_s14 }
 0x202   : > { %928 = dma.done.wait (!%p808_p8), %s592_s28, 16  }
 0x203   : > { %930 = vsyncadd (!%p808_p8), %s592_s28, 4294967280  ;;  %p18_p5 = scmp.ge.s32.totalorder %s1003_s21, 4   ;;  %s1162_s15 = smov %s937_s16 }
 0x204   : > { %s1163_s16 = smov %s941_s17  ;;  %s1164_s17 = smov %s1014_s24 }
 0x205   : > { %s1165_s18 = smov %s1003_s21  ;;  %20 = sbr.rel (!%p18_p5) target bundleno = 5 (0x5), region = 92 }
 0x20c   :  { %596 = vsyncpa [#allocation3], 1 }
 0x20d   :  { %598 = vsyncpa [#allocation3 + $0x1], 1 }
 0x20e   :  { %599 = vsyncpa [#allocation5], 1 }
 0x20f   :  { %601 = vsyncpa [#allocation5 + $0x1], 1 }

</bundles_post_ra>
